<compile_context>
chip_gen: v5e
topology: v5e:2x2
jax: 0.10.0
libtpu: 0.0.40
codegen_flags: <defaults>
</compile_context>

<pallas_src>
import functools

import jax
import jax.numpy as jnp
from jax import lax
from jax.experimental import pallas as pl
from jax.experimental.pallas import tpu as pltpu


def _round_up(n, m):
    return ((n + m - 1) // m) * m


# ----------------------------- Pallas kernel ------------------------------- #

def _make_fused_kernel(K, Wp, pad, H1, W1, W2, L2, L2p, Ltot, Cmid):
    """Fused conv1+ReLU -> conv2 -> spatial-softmax kernel (sizes baked in)."""
    tap_offs = [dh * Wp + dw for dh in range(K) for dw in range(K)]
    inv_wp = 1.0 / Wp

    def _row_col(n):
        # Exact row/col indices of a row-stride-Wp flattened coordinate.
        # (q + 0.5)/Wp keeps the quotient >= 0.5/Wp away from any integer, so
        # floor() is exact despite f32 rounding at these tiny magnitudes.
        q = lax.broadcasted_iota(jnp.int32, (1, n), 1).astype(jnp.float32)
        row = jnp.floor((q + 0.5) * inv_wp)
        col = q - row * Wp
        return q, row, col

    def kernel(xs_ref, w1_ref, b1_ref, w2_ref, o_ref, ys_ref):
        # ---- conv1 + bias + ReLU: one deep MXU matmul (contraction K*K*Cin) --
        acc1 = jnp.dot(w1_ref[...], xs_ref[...],
                       preferred_element_type=jnp.float32)        # [Cmid, Ltot]

        # Valid conv1 outputs occupy rows [pad, pad+H1), cols [pad, pad+W1) of
        # the conv2-input buffer (row stride Wp); everything else (halo ring,
        # wrap-around columns, tail) must be exact zero padding for conv2.
        _, row, col = _row_col(Ltot)
        my = ((row >= pad) & (row < pad + H1) &
              (col >= pad) & (col < pad + W1)).astype(jnp.float32)  # [1, Ltot]
        ys_ref[...] = jnp.maximum(acc1 + b1_ref[...], 0.0) * my     # aligned store

        # ---- conv2: sublane-stack K*K shifted views -> ONE matmul -----------
        y_stack = jnp.concatenate(
            [ys_ref[:, off:off + L2p] for off in tap_offs], axis=0)  # [KK*Cmid, L2p]
        z = jnp.dot(w2_ref[...], y_stack,
                    preferred_element_type=jnp.float32)              # [1, L2p]
        # conv2 bias intentionally omitted: constant shift cancelled by softmax.

        # ---- spatial softmax over valid grid cells (lane reductions) --------
        q2, _, col2 = _row_col(L2p)
        valid = (q2 < L2) & (col2 < W2)
        zm = jnp.where(valid, z, -1e30)
        m = jnp.max(zm, axis=1, keepdims=True)
        e = jnp.exp(zm - m)
        s = jnp.sum(e, axis=1, keepdims=True)
        o_ref[...] = e / s                                           # exact normalize

    return kernel


# ------------------------------ JAX wrapper -------------------------------- #

@functools.partial(jax.jit, static_argnums=(2, 3))
def attention_net_forward(x_nchw, params, kernel_size, same_padding=True):
    """Forward pass equivalent to attentionNet.forward (stride=1)."""
    w1, b1, w2, b2 = params                  # torch layouts: OIHW / [C]
    del b2                                   # no-op under the spatial softmax
    K = kernel_size
    pad = (K - 1) // 2 if same_padding else 0
    N, Cin, H, W = x_nchw.shape
    Cmid = w1.shape[0]
    Cout = w2.shape[0]
    assert N == 1 and Cout == 1, "torch reshape requires N * out_channels == 1"

    # Geometry.  Both layers' outputs are flattened with the SAME row stride
    # Wp (layer-1 padded width); invalid columns are masked in-kernel.
    Hp, Wp = H + 2 * pad, W + 2 * pad
    H1, W1 = Hp - K + 1, Wp - K + 1                       # conv1 output
    H2, W2 = H1 + 2 * pad - K + 1, W1 + 2 * pad - K + 1   # conv2 output
    L2 = H2 * Wp                                          # conv2 logits (flat)
    L2p = _round_up(L2, 128)                              # lane-dense logits
    off_store = pad * Wp + pad        # conv1 output offset inside conv2's halo
    tap_max = (K - 1) * Wp + (K - 1)  # largest tap offset
    Ltot = _round_up(tap_max + L2p, 128)                  # lane-dense y slab
    Lx = max(Ltot + tap_max, off_store + Hp * Wp)

    # ---- layout plumbing (one small XLA fusion around the kernel) ----
    xp = jnp.pad(x_nchw[0], ((0, 0), (pad, pad), (pad, pad)))       # [Cin,Hp,Wp]
    x_flat = jnp.pad(xp.reshape(Cin, Hp * Wp),
                     ((0, 0), (off_store, Lx - off_store - Hp * Wp)))
    x_flat = x_flat.astype(jnp.bfloat16)                            # hoisted cast
    tap_offs = [dh * Wp + dw for dh in range(K) for dw in range(K)]
    # Tap-stacked conv1 input: row block t holds all channels shifted by tap t.
    xs = jnp.concatenate([x_flat[:, o:o + Ltot] for o in tap_offs], axis=0)

    # Weights pre-stacked to match: column (t*C + c) <-> (tap t, channel c).
    w1s = jnp.transpose(w1, (0, 2, 3, 1)).reshape(Cmid, K * K * Cin)
    w1s = w1s.astype(jnp.bfloat16)
    w2s = jnp.transpose(w2, (0, 2, 3, 1)).reshape(Cout, K * K * Cmid)
    w2s = w2s.astype(jnp.float32)
    b1c = b1.reshape(Cmid, 1).astype(jnp.float32)

    kernel = _make_fused_kernel(K, Wp, pad, H1, W1, W2, L2, L2p, Ltot, Cmid)

    flops = 2 * Cmid * (K * K * Cin) * Ltot + 2 * Cout * (K * K * Cmid) * L2p
    bytes_accessed = (xs.size * 2 + w1s.size * 2 + b1c.size * 4 +
                      w2s.size * 4 + 4 * L2p)
    vmem = pltpu.MemorySpace.VMEM

    probs = pl.pallas_call(
        kernel,
        out_shape=jax.ShapeDtypeStruct((1, L2p), jnp.float32),
        in_specs=[pl.BlockSpec(memory_space=vmem) for _ in range(4)],
        out_specs=pl.BlockSpec(memory_space=vmem),
        scratch_shapes=[pltpu.VMEM((Cmid, Ltot), jnp.float32)],
        cost_estimate=pl.CostEstimate(flops=flops, transcendentals=L2p,
                                      bytes_accessed=bytes_accessed),
    )(xs, w1s, b1c, w2s)

    # TODO(synk): for large images / repeated per-frame calls, add a row-block
    # grid ("parallel" for v7x dual-TC, tiles sized for its 64 MiB VMEM) and
    # batch several frames along the lane axis with per-segment softmax.

    # Drop padded columns, back to the torch output shape (1, 1, H2, W2).
    return probs[0, :L2].reshape(H2, Wp)[:, :W2].reshape(1, 1, H2, W2)


# ----------------------------- params & reference --------------------------- #

def init_params(key, in_channels, out_channels, kernel_size, mid_channels=16):
    """Deterministic synthetic parameters in PyTorch OIHW layout."""
    k1, k2, k3, k4 = jax.random.split(key, 4)
    fan1 = in_channels * kernel_size * kernel_size
    fan2 = mid_channels * kernel_size * kernel_size
    w1 = jax.random.normal(k1, (mid_channels, in_channels, kernel_size,
                                kernel_size), jnp.float32) / jnp.sqrt(fan1)
    b1 = jax.random.normal(k2, (mid_channels,), jnp.float32) * 0.01
    w2 = jax.random.normal(k3, (out_channels, mid_channels, kernel_size,
                                kernel_size), jnp.float32) / jnp.sqrt(fan2)
    b2 = jax.random.normal(k4, (out_channels,), jnp.float32) * 0.01
    return (w1, b1, w2, b2)


def _reference_forward(x_nchw, params, kernel_size, same_padding=True):
    """Pure-JAX reference (lax convolutions, f32, includes b2)."""
    w1, b1, w2, b2 = params
    pad = (kernel_size - 1) // 2 if same_padding else 0
    dn = ("NCHW", "OIHW", "NCHW")
    y1 = lax.conv_general_dilated(x_nchw, w1, (1, 1),
                                  [(pad, pad), (pad, pad)],
                                  dimension_numbers=dn)
    y1 = jnp.maximum(y1 + b1.reshape(1, -1, 1, 1), 0.0)
    z = lax.conv_general_dilated(y1, w2, (1, 1),
                                 [(pad, pad), (pad, pad)],
                                 dimension_numbers=dn)
    z = z + b2.reshape(1, -1, 1, 1)
    H2, W2 = z.shape[2], z.shape[3]
    prob = jax.nn.softmax(z.reshape(-1))
    return prob.reshape(1, 1, H2, W2)


# ----------------------------------- main ----------------------------------- #

if __name__ == "__main__":
    in_channels, out_channels, kernel_size = 4, 1, 3
    H = W = 16

    key = jax.random.PRNGKey(0)
    kx, kp = jax.random.split(key)
    x = jax.random.normal(kx, (1, in_channels, H, W), jnp.float32)   # NCHW
    params = init_params(kp, in_channels, out_channels, kernel_size)

    for same_padding in (True, False):
        prob = jax.block_until_ready(
            attention_net_forward(x, params, kernel_size, same_padding))
        ref = _reference_forward(x, params, kernel_size, same_padding)
        assert prob.shape == ref.shape, (prob.shape, ref.shape)
        total = float(jnp.sum(prob))
        assert abs(total - 1.0) < 1e-3, total
        assert jnp.allclose(prob, ref, rtol=5e-2, atol=1e-3), float(
            jnp.max(jnp.abs(prob - ref)))

    print("KERNEL_OK")
</pallas_src>

<mosaic_0001>
module attributes {stable_mosaic.version = 11 : i64} {
  func.func @kernel(%arg0: memref<36x512xbf16, #tpu.memory_space<vmem>>, %arg1: memref<16x36xbf16, #tpu.memory_space<vmem>>, %arg2: memref<16x1xf32, #tpu.memory_space<vmem>>, %arg3: memref<1x144xf32, #tpu.memory_space<vmem>>, %arg4: memref<1x384xf32, #tpu.memory_space<vmem>>, %arg5: memref<16x512xf32, #tpu.memory_space<vmem>>) attributes {dimension_semantics = [], scalar_prefetch = 0 : i64, scratch_operands = 1 : i64, tpu.core_type = #tpu.core_type<tc>} {
    %c0 = arith.constant 0 : index
    %c0_0 = arith.constant 0 : index
    %0 = vector.load %arg1[%c0, %c0_0] : memref<16x36xbf16, #tpu.memory_space<vmem>>, vector<16x36xbf16>
    %c0_1 = arith.constant 0 : index
    %c0_2 = arith.constant 0 : index
    %1 = vector.load %arg0[%c0_1, %c0_2] : memref<36x512xbf16, #tpu.memory_space<vmem>>, vector<36x512xbf16>
    %cst = arith.constant dense<0.000000e+00> : vector<16x512xf32>
    %2 = tpu.matmul %0, %1, %cst {dimension_numbers = #tpu.dot_dimension_numbers<[1], [0], [0], [1], [0, 0, 1, 1], [], []>} : vector<16x36xbf16>, vector<36x512xbf16>, vector<16x512xf32> -> vector<16x512xf32>
    %3 = tpu.iota {dimensions = array<i32: 1>} : vector<1x512xi32>
    %4 = arith.sitofp %3 : vector<1x512xi32> to vector<1x512xf32>
    %cst_3 = arith.constant 5.000000e-01 : f32
    %5 = vector.broadcast %cst_3 : f32 to vector<1x512xf32>
    %6 = arith.addf %4, %5 : vector<1x512xf32>
    %cst_4 = arith.constant 0.055555556 : f32
    %7 = vector.broadcast %cst_4 : f32 to vector<1x512xf32>
    %8 = arith.mulf %6, %7 : vector<1x512xf32>
    %9 = math.floor %8 : vector<1x512xf32>
    %cst_5 = arith.constant 1.800000e+01 : f32
    %10 = vector.broadcast %cst_5 : f32 to vector<1x512xf32>
    %11 = arith.mulf %9, %10 : vector<1x512xf32>
    %12 = arith.subf %4, %11 : vector<1x512xf32>
    %cst_6 = arith.constant 1.000000e+00 : f32
    %13 = vector.broadcast %cst_6 : f32 to vector<1x512xf32>
    %14 = arith.cmpf oge, %9, %13 : vector<1x512xf32>
    %cst_7 = arith.constant 1.700000e+01 : f32
    %15 = vector.broadcast %cst_7 : f32 to vector<1x512xf32>
    %16 = arith.cmpf olt, %9, %15 : vector<1x512xf32>
    %17 = arith.andi %14, %16 : vector<1x512xi1>
    %cst_8 = arith.constant 1.000000e+00 : f32
    %18 = vector.broadcast %cst_8 : f32 to vector<1x512xf32>
    %19 = arith.cmpf oge, %12, %18 : vector<1x512xf32>
    %20 = arith.andi %17, %19 : vector<1x512xi1>
    %cst_9 = arith.constant 1.700000e+01 : f32
    %21 = vector.broadcast %cst_9 : f32 to vector<1x512xf32>
    %22 = arith.cmpf olt, %12, %21 : vector<1x512xf32>
    %23 = arith.andi %20, %22 : vector<1x512xi1>
    %24 = arith.extui %23 : vector<1x512xi1> to vector<1x512xi32>
    %25 = arith.sitofp %24 : vector<1x512xi32> to vector<1x512xf32>
    %c0_10 = arith.constant 0 : index
    %c0_11 = arith.constant 0 : index
    %26 = vector.load %arg2[%c0_10, %c0_11] : memref<16x1xf32, #tpu.memory_space<vmem>>, vector<16x1xf32>
    %27 = vector.broadcast %26 : vector<16x1xf32> to vector<16x512xf32>
    %28 = arith.addf %2, %27 : vector<16x512xf32>
    %cst_12 = arith.constant 0.000000e+00 : f32
    %29 = vector.broadcast %cst_12 : f32 to vector<16x512xf32>
    %30 = arith.maximumf %28, %29 : vector<16x512xf32>
    %31 = vector.broadcast %25 : vector<1x512xf32> to vector<16x512xf32>
    %32 = arith.mulf %30, %31 : vector<16x512xf32>
    %c0_13 = arith.constant 0 : index
    %c0_14 = arith.constant 0 : index
    %33 = vector.load %arg5[%c0_13, %c0_14] : memref<16x512xf32, #tpu.memory_space<vmem>>, vector<16x512xf32>
    tpu.vector_store %arg5[%c0_13, %c0_14], %32 {strides = array<i32>} : memref<16x512xf32, #tpu.memory_space<vmem>>, vector<16x512xf32>,
    %c0_15 = arith.constant 0 : index
    %c0_16 = arith.constant 0 : index
    %34 = vector.load %arg5[%c0_15, %c0_16] : memref<16x512xf32, #tpu.memory_space<vmem>>, vector<16x384xf32>
    %c0_17 = arith.constant 0 : index
    %c1 = arith.constant 1 : index
    %35 = vector.load %arg5[%c0_17, %c1] : memref<16x512xf32, #tpu.memory_space<vmem>>, vector<16x384xf32>
    %c0_18 = arith.constant 0 : index
    %c2 = arith.constant 2 : index
    %36 = vector.load %arg5[%c0_18, %c2] : memref<16x512xf32, #tpu.memory_space<vmem>>, vector<16x384xf32>
    %c0_19 = arith.constant 0 : index
    %c18 = arith.constant 18 : index
    %37 = vector.load %arg5[%c0_19, %c18] : memref<16x512xf32, #tpu.memory_space<vmem>>, vector<16x384xf32>
    %c0_20 = arith.constant 0 : index
    %c19 = arith.constant 19 : index
    %38 = vector.load %arg5[%c0_20, %c19] : memref<16x512xf32, #tpu.memory_space<vmem>>, vector<16x384xf32>
    %c0_21 = arith.constant 0 : index
    %c20 = arith.constant 20 : index
    %39 = vector.load %arg5[%c0_21, %c20] : memref<16x512xf32, #tpu.memory_space<vmem>>, vector<16x384xf32>
    %c0_22 = arith.constant 0 : index
    %c36 = arith.constant 36 : index
    %40 = vector.load %arg5[%c0_22, %c36] : memref<16x512xf32, #tpu.memory_space<vmem>>, vector<16x384xf32>
    %c0_23 = arith.constant 0 : index
    %c37 = arith.constant 37 : index
    %41 = vector.load %arg5[%c0_23, %c37] : memref<16x512xf32, #tpu.memory_space<vmem>>, vector<16x384xf32>
    %c0_24 = arith.constant 0 : index
    %c38 = arith.constant 38 : index
    %42 = vector.load %arg5[%c0_24, %c38] : memref<16x512xf32, #tpu.memory_space<vmem>>, vector<16x384xf32>
    %43 = tpu.concatenate %34, %35, %36, %37, %38, %39, %40, %41, %42 in 0 : vector<16x384xf32>, vector<16x384xf32>, vector<16x384xf32>, vector<16x384xf32>, vector<16x384xf32>, vector<16x384xf32>, vector<16x384xf32>, vector<16x384xf32>, vector<16x384xf32> -> vector<144x384xf32>
    %c0_25 = arith.constant 0 : index
    %c0_26 = arith.constant 0 : index
    %44 = vector.load %arg3[%c0_25, %c0_26] : memref<1x144xf32, #tpu.memory_space<vmem>>, vector<1x144xf32>
    %cst_27 = arith.constant dense<0.000000e+00> : vector<1x384xf32>
    %45 = tpu.matmul %44, %43, %cst_27 {dimension_numbers = #tpu.dot_dimension_numbers<[1], [0], [0], [1], [0, 0, 1, 1], [], []>} : vector<1x144xf32>, vector<144x384xf32>, vector<1x384xf32> -> vector<1x384xf32>
    %46 = tpu.iota {dimensions = array<i32: 1>} : vector<1x384xi32>
    %47 = arith.sitofp %46 : vector<1x384xi32> to vector<1x384xf32>
    %cst_28 = arith.constant 5.000000e-01 : f32
    %48 = vector.broadcast %cst_28 : f32 to vector<1x384xf32>
    %49 = arith.addf %47, %48 : vector<1x384xf32>
    %cst_29 = arith.constant 0.055555556 : f32
    %50 = vector.broadcast %cst_29 : f32 to vector<1x384xf32>
    %51 = arith.mulf %49, %50 : vector<1x384xf32>
    %52 = math.floor %51 : vector<1x384xf32>
    %cst_30 = arith.constant 1.800000e+01 : f32
    %53 = vector.broadcast %cst_30 : f32 to vector<1x384xf32>
    %54 = arith.mulf %52, %53 : vector<1x384xf32>
    %55 = arith.subf %47, %54 : vector<1x384xf32>
    %cst_31 = arith.constant 2.880000e+02 : f32
    %56 = vector.broadcast %cst_31 : f32 to vector<1x384xf32>
    %57 = arith.cmpf olt, %47, %56 : vector<1x384xf32>
    %cst_32 = arith.constant 1.600000e+01 : f32
    %58 = vector.broadcast %cst_32 : f32 to vector<1x384xf32>
    %59 = arith.cmpf olt, %55, %58 : vector<1x384xf32>
    %60 = arith.andi %57, %59 : vector<1x384xi1>
    %cst_33 = arith.constant -1.000000e+30 : f32
    %61 = vector.broadcast %cst_33 : f32 to vector<1x384xf32>
    %62 = arith.select %60, %45, %61 : vector<1x384xi1>, vector<1x384xf32>
    %cst_34 = arith.constant dense<0xFF800000> : vector<1xf32>
    %63 = vector.multi_reduction <maximumf>, %62, %cst_34 [1] : vector<1x384xf32> to vector<1xf32>
    %64 = vector.shape_cast %63 : vector<1xf32> to vector<1x1xf32>
    %65 = vector.broadcast %64 : vector<1x1xf32> to vector<1x384xf32>
    %66 = arith.subf %62, %65 : vector<1x384xf32>
    %67 = math.exp %66 : vector<1x384xf32>
    %cst_35 = arith.constant dense<0.000000e+00> : vector<1xf32>
    %68 = vector.multi_reduction <add>, %67, %cst_35 [1] : vector<1x384xf32> to vector<1xf32>
    %69 = vector.shape_cast %68 : vector<1xf32> to vector<1x1xf32>
    %70 = vector.broadcast %69 : vector<1x1xf32> to vector<1x384xf32>
    %71 = arith.divf %67, %70 : vector<1x384xf32>
    %c0_36 = arith.constant 0 : index
    %c0_37 = arith.constant 0 : index
    %72 = vector.load %arg4[%c0_36, %c0_37] : memref<1x384xf32, #tpu.memory_space<vmem>>, vector<1x384xf32>
    tpu.vector_store %arg4[%c0_36, %c0_37], %71 {strides = array<i32>} : memref<1x384xf32, #tpu.memory_space<vmem>>, vector<1x384xf32>,
    return
  }
}

</mosaic_0001>

<bundles_post_ra>
// kernel: squeeze.3
= control target key start
LH: loop header
LB: loop body
LE: loop exit
PB: predicated region body
PF: predicated region fallthrough
CT: control target
= control target key end

     0   :  { %vm98_vm0 = vcmask 1014784   ;;  %s154_s8 = smov 4   ;;  %vm111_vm1 = vcmask 1031168   ;;  %s155_s9 = smov 110   ;;  %vm7_vm2 = vcmask 146432   ;;  %vm102_vm3 = vcmask 31744   ;;  %s249_s0 = inlined_call_operand.vmem [shape: f32[288], index: 0, kind: input, shape index: {}]   ;;  %s250_s1 = inlined_call_operand.vmem [shape: f32[16,18], index: 1, kind: output, shape index: {}]  }
   0x1   :  { %v4_v0 = vld [vmem:[%s249_s0] sm:$0xf]  ;;  %s153_s0 = smov 114   ;;  %s156_s10 = smov 112   ;;  %vm105_vm4 = vcmask 146464   ;;  %vm115_vm5 = vcmask 15360  }
   0x2   :  { %5 = vst [vmem:[#allocation0] sm:$0xf] %v4_v0  ;;  %s157_s11 = smov 2   ;;  %s158_s12 = smov 94   ;;  %vm118_vm6 = vcmask 146448  }
   0x3   :  { %s159_s13 = smov 92   ;;  %s160_s14 = smov 76  }
   0x4   :  { %s161_s15 = smov 74   ;;  %s162_s16 = smov 58  }
   0x5   :  { %s163_s17 = smov 56   ;;  %s164_s18 = smov 40  }
   0x6   :  { %s165_s19 = smov 38   ;;  %s166_s20 = smov 22  }
   0x7   :  { %s167_s21 = smov 20  }
   0x9   :  { %v95_v1 = vld [vmem:[#allocation0 + $0x1] sm:$0x1]   ;;  %v97_v2 = vld [vmem:[#allocation0 + $0x2] sm:$0x1]   ;;  %v23_v5 = vld [vmem:[#allocation0] sm:$0x1]  }
   0xa   :  { %v10_v3 = vld [vmem:[#allocation0 + $0x2] sm:$0x1]   ;;  %v99_v4 = vsel %vm98_vm0, %v97_v2, %v95_v1  ;;  %v108_v6 = vld [vmem:[#allocation0] sm:$0x1]   ;;  %v110_v7 = vld [vmem:[#allocation0 + $0x1] sm:$0x1]   ;;  %24 = vrot.lane.b32.xlu2 %v23_v5, %s155_s9 }
   0xb   :  { %11 = vrot.lane.b32.xlu0 %v10_v3, %s153_s0  ;;  %100 = vrot.lane.b32.xlu1 %v99_v4, %s154_s8  ;;  %v17_v8 = vld [vmem:[#allocation0 + $0x1] sm:$0x1]   ;;  %v112_v9 = vsel %vm111_vm1, %v110_v7, %v108_v6  ;;  %v36_v11 = vld [vmem:[#allocation0] sm:$0x1]  }
   0xc   :  { %v30_v10 = vld [vmem:[#allocation0 + $0x1] sm:$0x1]   ;;  %v49_v13 = vld [vmem:[#allocation0] sm:$0x1]  }
   0xd   :  { %v43_v12 = vld [vmem:[#allocation0 + $0x1] sm:$0x1]   ;;  %v62_v15 = vld [vmem:[#allocation0] sm:$0x1]  }
   0xe   :  { %v56_v14 = vld [vmem:[#allocation0 + $0x1] sm:$0x1]   ;;  %v75_v17 = vld [vmem:[#allocation0] sm:$0x1]  }
   0xf   :  { %v69_v16 = vld [vmem:[#allocation0 + $0x1] sm:$0x1]   ;;  %v88_v19 = vld [vmem:[#allocation0] sm:$0x1]  }
  0x10   :  { %v82_v18 = vld [vmem:[#allocation0 + $0x1] sm:$0x1]   ;;  %v6_v25 = vld [vmem:[#allocation0] sm:$0x1]  }
  0x11   :  { %8 = vst.msk [vmem:[%s250_s1] sm:$0x1] %vm7_vm2, %v6_v25  }
  0x12   :  { %31 = vrot.lane.b32.xlu2 %v30_v10, %s158_s12 }
  0x13   :  { %18 = vrot.lane.b32.xlu0 %v17_v8, %s156_s10  ;;  %113 = vrot.lane.b32.xlu1 %v112_v9, %s157_s11 }
  0x1a   :  { %50 = vrot.lane.b32.xlu2 %v49_v13, %s161_s15 }
  0x1b   :  { %37 = vrot.lane.b32.xlu0 %v36_v11, %s159_s13  ;;  %44 = vrot.lane.b32.xlu1 %v43_v12, %s160_s14 }
  0x22   :  { %70 = vrot.lane.b32.xlu2 %v69_v16, %s164_s18 }
  0x23   :  { %57 = vrot.lane.b32.xlu0 %v56_v14, %s162_s16  ;;  %63 = vrot.lane.b32.xlu1 %v62_v15, %s163_s17 }
  0x2a   :  { %89 = vrot.lane.b32.xlu2 %v88_v19, %s167_s21 }
  0x2b   :  { %76 = vrot.lane.b32.xlu0 %v75_v17, %s165_s19  ;;  %83 = vrot.lane.b32.xlu1 %v82_v18, %s166_s20 }
  0x64   :  { %v25_v20 = vpop.permute.xlu2 %24  }
  0x65   :  { %123 = vst.msk [vmem:[%s250_s1 + $0x1] sm:$0x1] %vm7_vm2, %v25_v20  }
  0x6c   :  { %v32_v21 = vpop.permute.xlu2 %31  }
  0x6d   :  { %124 = vst.msk [vmem:[%s250_s1 + $0x9] sm:$0x1] %vm7_vm2, %v32_v21  }
  0x74   :  { %v51_v22 = vpop.permute.xlu2 %50  }
  0x75   :  { %127 = vst.msk [vmem:[%s250_s1 + $0x3] sm:$0x1] %vm7_vm2, %v51_v22  }
  0x7c   :  { %v71_v26 = vpop.permute.xlu2 %70  }
  0x7d   :  { %v12_v23 = vpop.permute.xlu0 %11   ;;  %v101_v24 = vpop.permute.xlu1 %100   ;;  %130 = vst.msk [vmem:[%s250_s1 + $0xc] sm:$0x1] %vm7_vm2, %v71_v26  }
  0x7e   :  { %121 = vst.msk [vmem:[%s250_s1 + $0xf] sm:$0x1] %vm7_vm2, %v12_v23  }
  0x7f   :  { %134 = vst.msk [vmem:[%s250_s1 + $0xe] sm:$0x1] %vm102_vm3, %v101_v24  }
  0x80   :  { %135 = vst.msk [vmem:[%s250_s1 + $0xe] sm:$0x1] %vm105_vm4, %v101_v24  }
  0x84   :  { %v90_v29 = vpop.permute.xlu2 %89  }
  0x85   :  { %v19_v27 = vpop.permute.xlu0 %18   ;;  %v114_v28 = vpop.permute.xlu1 %113   ;;  %133 = vst.msk [vmem:[%s250_s1 + $0x6] sm:$0x1] %vm7_vm2, %v90_v29  }
  0x86   :  { %122 = vst.msk [vmem:[%s250_s1 + $0x8] sm:$0x1] %vm7_vm2, %v19_v27  }
  0x87   :  { %136 = vst.msk [vmem:[%s250_s1 + $0x7] sm:$0x1] %vm115_vm5, %v114_v28  }
  0x88   :  { %137 = vst.msk [vmem:[%s250_s1 + $0x7] sm:$0x1] %vm118_vm6, %v114_v28  }
  0x8d   :  { %v38_v30 = vpop.permute.xlu0 %37   ;;  %v45_v31 = vpop.permute.xlu1 %44  }
  0x8e   :  { %125 = vst.msk [vmem:[%s250_s1 + $0x2] sm:$0x1] %vm7_vm2, %v38_v30  }
  0x8f   :  { %126 = vst.msk [vmem:[%s250_s1 + $0xa] sm:$0x1] %vm7_vm2, %v45_v31  }
  0x95   :  { %v58_v32 = vpop.permute.xlu0 %57   ;;  %v64_v33 = vpop.permute.xlu1 %63  }
  0x96   :  { %128 = vst.msk [vmem:[%s250_s1 + $0xb] sm:$0x1] %vm7_vm2, %v58_v32  }
  0x97   :  { %129 = vst.msk [vmem:[%s250_s1 + $0x4] sm:$0x1] %vm7_vm2, %v64_v33  }
  0x9d   :  { %v77_v34 = vpop.permute.xlu0 %76   ;;  %v84_v35 = vpop.permute.xlu1 %83  }
  0x9e   :  { %131 = vst.msk [vmem:[%s250_s1 + $0x5] sm:$0x1] %vm7_vm2, %v77_v34  }
  0x9f   :  { %132 = vst.msk [vmem:[%s250_s1 + $0xd] sm:$0x1] %vm7_vm2, %v84_v35  }

// kernel: attention_net_forward.1
= control target key start
LH: loop header
LB: loop body
LE: loop exit
PB: predicated region body
PF: predicated region fallthrough
CT: control target
= control target key end

     0   :  { %v946_v2 = vmov 0   ;;  %vm166_vm0 = vcmask 1041408   ;;  %vm162_vm1 = vcmask 293888   ;;  %v30_v42 = vlaneseq  ;;  %s951_s5 = smov 108   ;;  %s952_s6 = smov 126   ;;  %s1336_s0 = inlined_call_operand.vmem [shape: bf16[36,512], index: 0, kind: input, shape index: {}]   ;;  %s1337_s2 = inlined_call_operand.vmem [shape: f32[16,1], index: 2, kind: input, shape index: {}]   ;;  %s1338_s1 = inlined_call_operand.vmem [shape: bf16[16,36], index: 1, kind: input, shape index: {}]   ;;  %s1339_s3 = inlined_call_operand.vmem [shape: f32[1,144], index: 3, kind: input, shape index: {}]   ;;  %s1340_s4 = inlined_call_operand.vmem [shape: f32[1,384], index: 4, kind: output, shape index: {}]  }
   0x1   :  { %v28_v0 = vld [vmem:[%s1336_s0 + $0x40] sm:$0x33]  ;;  %v29_v1 = vld [vmem:[%s1336_s0 + $0x48] sm:$0x33]  ;;  %777 = vset.pattern.permute.xlu0 %v946_v2  ;;  %v765_v8 = vld [vmem:[%s1336_s0 + $0x2c] sm:$0xf0] }
   0x2   :  { %v138_v3 = vunpack.c.l.b16 %v28_v0  ;;  %v139_v4 = vunpack.c.h.b16 %v28_v0  ;;  %v140_v5 = vunpack.c.l.b16 %v29_v1  ;;  %v141_v6 = vunpack.c.h.b16 %v29_v1  ;;  %v737_v7 = vld [vmem:[%s1336_s0 + $0x20] sm:$0xf]  ;;  %v763_v13 = vld [vmem:[%s1336_s0 + $0x24] sm:$0xf]  ;;  %v739_v14 = vld [vmem:[%s1336_s0 + $0x30] sm:$0xf0] }
   0x3   :  { %v745_v15 = vld [vmem:[%s1336_s0 + $0x28] sm:$0xf]  ;;  %v766_v16 = vld [vmem:[%s1336_s0 + $0x34] sm:$0xf0]  ;;  %v764_v17 = vld [vmem:[%s1336_s0 + $0x2c] sm:$0xf]  ;;  %v738_v23 = vor.u32 %v765_v8, %v737_v7  ;;  %v742_v24 = vor.u32 %v763_v13, %v739_v14 }
   0x4   :  { %v150_v9 = vpack.c.b16 %v138_v3, %v138_v3  ;;  %v151_v10 = vpack.c.b16 %v139_v4, %v139_v4  ;;  %v152_v11 = vpack.c.b16 %v140_v5, %v140_v5  ;;  %v153_v12 = vpack.c.b16 %v141_v6, %v141_v6  ;;  %v747_v18 = vld [vmem:[%s1336_s0 + $0x38] sm:$0xf0]  ;;  %v721_v25 = vld [vmem:[%s1336_s0] sm:$0xf]  ;;  %v761_v26 = vld [vmem:[%s1336_s0 + $0xc] sm:$0xf0] }
   0x5   :  { %v759_v27 = vld [vmem:[%s1336_s0 + $0x4] sm:$0xf]  ;;  %v746_v28 = vor.u32 %v766_v16, %v745_v15  ;;  %v750_v29 = vor.u32 %v764_v17, %v747_v18  ;;  %v723_v30 = vld [vmem:[%s1336_s0 + $0x10] sm:$0xf0]  ;;  %v729_v31 = vld [vmem:[%s1336_s0 + $0x8] sm:$0xf]  ;;  %v722_v36 = vor.u32 %v761_v26, %v721_v25 }
   0x6   :  { %v168_v19 = vsel %vm166_vm0, %v150_v9, 0  ;;  %v171_v20 = vsel %vm166_vm0, %v151_v10, 0  ;;  %v174_v21 = vsel %vm166_vm0, %v152_v11, 0  ;;  %v177_v22 = vsel %vm166_vm0, %v153_v12, 0  ;;  %v96_v32 = vld [vmem:[%s1337_s2 + $0x8] sm:$0xff]  ;;  %v758_v40 = vld [vmem:[%s1338_s1] sm:$0xff] }
   0x7   :  { %184 = vmatpush.bf16.msra.mxu0 %v168_v19  ;;  %198 = vmatpush.bf16.msra.mxu1 %v171_v20  ;;  %v762_v33 = vld [vmem:[%s1336_s0 + $0x14] sm:$0xf0]  ;;  %v760_v34 = vld [vmem:[%s1336_s0 + $0xc] sm:$0xf]  ;;  %v731_v35 = vld [vmem:[%s1336_s0 + $0x18] sm:$0xf0]  ;;  %v726_v37 = vor.u32 %v759_v27, %v723_v30 }
   0x8   :  { %212 = vmatpush.bf16.msra.mxu2 %v174_v21  ;;  %226 = vmatpush.bf16.msra.mxu3 %v177_v22  ;;  %v730_v38 = vor.u32 %v762_v33, %v729_v31  ;;  %v734_v39 = vor.u32 %v760_v34, %v731_v35  ;;  %v95_v41 = vld [vmem:[%s1337_s2] sm:$0xff]  ;;  %v31_v43 = vand.u32 127, %v30_v42  ;;  %v947_v6 = vmov 0.0   ;;  %s948_s0 = smov 90   ;;  %s949_s1 = smov 92  }
   0x9   :  { %104 = vperm.xlu0 %777, %v96_v32   ;;  %s950_s2 = smov 91   ;;  %s953_s7 = smov 109  }
   0xa   :  { %v32_v44 = vadd.s32 128, %v31_v43  ;;  %v1049_v45 = vcvt.s32.f32 %v31_v43  ;;  %v33_v48 = vadd.s32 256, %v31_v43  ;;  %v34_v13 = vadd.s32 384, %v31_v43  ;;  %s954_s8 = smov 110   ;;  %s955_s9 = smov 127  }
   0xb   :  { %185 = vmatpush.bf16.msra.mxu0 %v738_v23  ;;  %199 = vmatpush.bf16.msra.mxu1 %v742_v24 }
   0xc   :  { %213 = vmatpush.bf16.msra.mxu2 %v746_v28  ;;  %227 = vmatpush.bf16.msra.mxu3 %v750_v29  ;;  %v1051_v46 = vcvt.s32.f32 %v32_v44  ;;  %v39_v47 = vadd.f32 0.5, %v1049_v45  ;;  %v1055_v51 = vcvt.s32.f32 %v33_v48  ;;  %v38_v19 = vcvt.s32.f32 %v34_v13 }
   0xe   :  { %v40_v49 = vadd.f32 0.5, %v1051_v46  ;;  %v43_v50 = vmul.f32 0.055555556, %v39_v47  ;;  %v41_v54 = vadd.f32 0.5, %v1055_v51  ;;  %v42_v23 = vadd.f32 0.5, %v38_v19 }
   0xf   :  { %186 = vmatpush.bf16.msra.mxu0 %v722_v36  ;;  %200 = vmatpush.bf16.msra.mxu1 %v726_v37 }
  0x10   :  { %214 = vmatpush.bf16.msra.mxu2 %v730_v38  ;;  %228 = vmatpush.bf16.msra.mxu3 %v734_v39  ;;  %v44_v52 = vmul.f32 0.055555556, %v40_v49  ;;  %v47_v53 = vfloor.f32 %v43_v50  ;;  %v45_v57 = vmul.f32 0.055555556, %v41_v54  ;;  %v46_v27 = vmul.f32 0.055555556, %v42_v23 }
  0x11   :  { %99 = vperm.xlu0 %777, %v95_v41  }
  0x12   :  { %751 = vmatmul.msk.bf16.vlgmr.msra.gmra.mxu0 %vm162_vm1, %v758_v40  ;;  %752 = vmatmul.msk.bf16.vlgmr.msra.gmra.mxu1 %vm162_vm1, %v758_v40  ;;  %v48_v55 = vfloor.f32 %v44_v52  ;;  %v51_v56 = vmul.f32 18.0, %v47_v53  ;;  %v49_v60 = vfloor.f32 %v45_v57  ;;  %vm59_vm2 = vcmp.ge.f32.partialorder %v47_v53, 1.0 }
  0x13   :  { %753 = vmatmul.msk.bf16.vlgmr.msra.gmra.mxu2 %vm162_vm1, %v758_v40  ;;  %754 = vmatmul.msk.bf16.vlgmr.msra.gmra.mxu3 %vm162_vm1, %v758_v40  ;;  %vm63_vm3 = vcmp.lt.f32.partialorder %v47_v53, 17.0  ;;  %v50_v30 = vfloor.f32 %v46_v27 }
  0x14   :  { %v52_v58 = vmul.f32 18.0, %v48_v55  ;;  %v1059_v59 = vsub.f32 %v1049_v45, %v51_v56  ;;  %vm60_vm4 = vcmp.ge.f32.partialorder %v48_v55, 1.0  ;;  %vm64_vm5 = vcmp.lt.f32.partialorder %v48_v55, 17.0  ;;  %vm67_vm6 = vmand %vm59_vm2, %vm63_vm3 }
  0x15   :  { %v53_v63 = vmul.f32 18.0, %v49_v60  ;;  %vm68_vm8 = vmand %vm60_vm4, %vm64_vm5  ;;  %vm61_vm14 = vcmp.ge.f32.partialorder %v49_v60, 1.0  ;;  %vm65_vm15 = vcmp.lt.f32.partialorder %v49_v60, 17.0  ;;  %v54_v34 = vmul.f32 18.0, %v50_v30 }
  0x16   :  { %v1064_v62 = vsub.f32 %v1051_v46, %v52_v58  ;;  %vm71_vm7 = vcmp.ge.f32.partialorder %v1059_v59, 1.0  ;;  %vm79_vm11 = vcmp.lt.f32.partialorder %v1059_v59, 17.0  ;;  %vm69_vm3 = vmand %vm61_vm14, %vm65_vm15  ;;  %vm500_vm15 = vcmask 736256  }
  0x17   :  { %vm75_vm10 = vmand %vm67_vm6, %vm71_vm7  ;;  %v1071_v0 = vsub.f32 %v1055_v51, %v53_v63  ;;  %v58_v36 = vsub.f32 %v38_v19, %v54_v34 }
  0x18   :  { %vm72_vm9 = vcmp.ge.f32.partialorder %v1064_v62, 1.0  ;;  %vm80_vm13 = vcmp.lt.f32.partialorder %v1064_v62, 17.0  ;;  %vm83_vm1 = vmand %vm75_vm10, %vm79_vm11 }
  0x19   :  { %vm76_vm12 = vmand %vm68_vm8, %vm72_vm9  ;;  %vm73_vm4 = vcmp.ge.f32.partialorder %v1071_v0, 1.0  ;;  %v711_v7 = vsel %vm83_vm1, 1.0, %v947_v6  ;;  %vm81_vm6 = vcmp.lt.f32.partialorder %v1071_v0, 17.0  ;;  %vm62_vm8 = vcmp.ge.f32.partialorder %v50_v30, 1.0 }
  0x1a   :  { %vm84_vm2 = vmand %vm76_vm12, %vm80_vm13  ;;  %vm66_vm9 = vcmp.lt.f32.partialorder %v50_v30, 17.0  ;;  %vm74_vm11 = vcmp.ge.f32.partialorder %v58_v36, 1.0  ;;  %vm82_vm13 = vcmp.lt.f32.partialorder %v58_v36, 17.0  ;;  %vm518_vm1 = vcmask 130048  }
  0x1b   :  { %v712_v8 = vsel %vm84_vm2, 1.0, %v947_v6  ;;  %vm77_vm5 = vmand %vm69_vm3, %vm73_vm4  ;;  %vm471_vm2 = vcmask 744448   ;;  %vm442_vm3 = vcmask 752640   ;;  %vm413_vm4 = vcmask 883712  }
  0x1c   :  { %vm85_vm7 = vmand %vm77_vm5, %vm81_vm6  ;;  %vm384_vm5 = vcmask 891904   ;;  %vm355_vm6 = vcmask 900096  }
  0x1d   :  { %v1089_v18 = vsel %vm85_vm7, 1.0, %v947_v6  ;;  %vm70_vm10 = vmand %vm62_vm8, %vm66_vm9  ;;  %vm326_vm7 = vcmask 1031168   ;;  %vm297_vm8 = vcmask 1039360   ;;  %vm642_vm9 = vcmp.lt.f32.partialorder %v1051_v46, 288.0 }
  0x1e   :  { %vm78_vm12 = vmand %vm70_vm10, %vm74_vm11  ;;  %vm645_vm10 = vcmp.lt.f32.partialorder %v1064_v62, 16.0  ;;  %vm641_vm11 = vcmp.lt.f32.partialorder %v1049_v45, 288.0 }
  0x1f   :  { %vm86_vm14 = vmand %vm78_vm12, %vm82_vm13  ;;  %vm644_vm12 = vcmp.lt.f32.partialorder %v1059_v59, 16.0 }
  0x20   :  { %v714_v47 = vsel %vm86_vm14, 1.0, %v947_v6  ;;  %vm648_vm13 = vmand %vm642_vm9, %vm645_vm10  ;;  %vm643_vm14 = vcmp.lt.f32.partialorder %v1055_v51, 288.0 }
  0x7b   :  { %v1061_v61 = vpop.permute.xlu0 %104 }
  0x83   :  { %v1073_v1 = vpop.permute.xlu0 %99 }
  0x8f   :  { %v188_v2 = vpop.f32.mrf.mxu0  ;;  %v202_v3 = vpop.f32.mrf.mxu1 }
  0x90   :  { %v189_v4 = vadd.f32 %v188_v2, %v1073_v1  ;;  %v203_v5 = vadd.f32 %v202_v3, %v1073_v1 }
  0x92   :  { %v235_v9 = vmax.f32 %v189_v4, 0.0  ;;  %v236_v10 = vmax.f32 %v203_v5, 0.0 }
  0x94   :  { %v1081_v11 = vmul.f32 %v711_v7, %v235_v9  ;;  %v1083_v12 = vmul.f32 %v712_v8, %v236_v10 }
  0x96   :  { %v216_v14 = vpop.f32.mrf.mxu2  ;;  %v778_v15 = vpack.i.bf16 %v1083_v12, %v1081_v11  ;;  %v230_v31 = vpop.f32.mrf.mxu3 }
  0x97   :  { %v217_v16 = vadd.f32 %v216_v14, %v1073_v1  ;;  %v190_v17 = vpop.f32.mrf.mxu0  ;;  %v204_v26 = vpop.f32.mrf.mxu1  ;;  %v231_v40 = vadd.f32 %v230_v31, %v1073_v1 }
  0x98   :  { %779 = vrot.lane.b32.xlu0 %v778_v15, %s948_s0  ;;  %v191_v21 = vadd.f32 %v190_v17, %v1061_v61  ;;  %v205_v29 = vadd.f32 %v204_v26, %v1061_v61 }
  0x99   :  { %v237_v20 = vmax.f32 %v217_v16, 0.0  ;;  %v238_v44 = vmax.f32 %v231_v40, 0.0 }
  0x9a   :  { %v239_v25 = vmax.f32 %v191_v21, 0.0  ;;  %v240_v32 = vmax.f32 %v205_v29, 0.0 }
  0x9b   :  { %v1094_v22 = vmul.f32 %v1089_v18, %v237_v20  ;;  %v246_v50 = vmul.f32 %v714_v47, %v238_v44 }
  0x9c   :  { %v1101_v28 = vmul.f32 %v711_v7, %v239_v25  ;;  %v1109_v35 = vmul.f32 %v712_v8, %v240_v32 }
  0x9d   :  { %v788_v24 = vpack.i.bf16 %v1094_v22, %v1083_v12 }
  0x9e   :  { %v818_v33 = vpack.i.bf16 %v1081_v11, %v1101_v28  ;;  %v833_v37 = vpack.i.bf16 %v1109_v35, %v1101_v28  ;;  %v232_v38 = vpop.f32.mrf.mxu3  ;;  %v218_v41 = vpop.f32.mrf.mxu2 }
  0x9f   :  { %789 = vrot.lane.b32.xlu2 %v788_v24, %s949_s1  ;;  %784 = vrot.lane.b32.xlu1 %v788_v24, %s950_s2  ;;  %v233_v39 = vadd.f32 %v232_v38, %v1061_v61  ;;  %v219_v48 = vadd.f32 %v218_v41, %v1061_v61 }
  0xa0   :  { %794 = vrot.lane.b32.xlu0 %v788_v24, %s951_s5 }
  0xa1   :  { %v242_v43 = vmax.f32 %v233_v39, 0.0  ;;  %v241_v52 = vmax.f32 %v219_v48, 0.0 }
  0xa3   :  { %v250_v49 = vmul.f32 %v714_v47, %v242_v43  ;;  %v1127_v54 = vmul.f32 %v1089_v18, %v241_v52 }
  0xa5   :  { %v878_v53 = vpack.i.bf16 %v246_v50, %v250_v49  ;;  %v858_v55 = vpack.i.bf16 %v1127_v54, %v1109_v35  ;;  %v903_v56 = vpack.i.bf16 %v1094_v22, %v1127_v54 }
  0xa7   :  { %809 = vrot.lane.b32.xlu2 %v788_v24, %s952_s6  ;;  %799 = vrot.lane.b32.xlu1 %v788_v24, %s953_s7 }
  0xa8   :  { %819 = vrot.lane.b32.xlu0 %v818_v33, %s950_s2 }
  0xaf   :  { %829 = vrot.lane.b32.xlu2 %v818_v33, %s951_s5  ;;  %804 = vrot.lane.b32.xlu1 %v788_v24, %s954_s8 }
  0xb0   :  { %834 = vrot.lane.b32.xlu0 %v833_v37, %s948_s0 }
  0xb7   :  { %839 = vrot.lane.b32.xlu2 %v818_v33, %s953_s7  ;;  %814 = vrot.lane.b32.xlu1 %v788_v24, %s955_s9  ;;  %v1192_v24 = vld [vmem:[%s1339_s3] sm:$0x3] }
  0xb8   :  { %844 = vrot.lane.b32.xlu0 %v818_v33, %s954_s8  ;;  %v1195_v25 = vperm.slane %v1192_v24, 1 }
  0xbf   :  { %849 = vrot.lane.b32.xlu2 %v818_v33, %s952_s6  ;;  %824 = vrot.lane.b32.xlu1 %v818_v33, %s949_s1 }
  0xc0   :  { %879 = vrot.lane.b32.xlu0 %v878_v53, %s949_s1 }
  0xc7   :  { %859 = vrot.lane.b32.xlu2 %v858_v55, %s949_s1  ;;  %854 = vrot.lane.b32.xlu1 %v858_v55, %s950_s2 }
  0xc8   :  { %894 = vrot.lane.b32.xlu0 %v858_v55, %s952_s6 }
  0xcf   :  { %869 = vrot.lane.b32.xlu2 %v878_v53, %s950_s2  ;;  %864 = vrot.lane.b32.xlu1 %v858_v55, %s951_s5 }
  0xd0   :  { %919 = vrot.lane.b32.xlu0 %v878_v53, %s954_s8 }
  0xd7   :  { %874 = vrot.lane.b32.xlu2 %v858_v55, %s953_s7  ;;  %884 = vrot.lane.b32.xlu1 %v858_v55, %s954_s8 }
  0xd8   :  { %924 = vrot.lane.b32.xlu0 %v878_v53, %s952_s6 }
  0xdf   :  { %889 = vrot.lane.b32.xlu2 %v878_v53, %s951_s5  ;;  %899 = vrot.lane.b32.xlu1 %v878_v53, %s953_s7 }
  0xe0   :  { %934 = vrot.lane.b32.xlu0 %v878_v53, %s955_s9 }
  0xe7   :  { %914 = vrot.lane.b32.xlu2 %v858_v55, %s955_s9  ;;  %904 = vrot.lane.b32.xlu1 %v903_v56, %s948_s0 }
  0xef   :  { %929 = vrot.lane.b32.xlu2 %v878_v53, %s948_s0  ;;  %909 = vrot.lane.b32.xlu1 %v818_v33, %s955_s9 }
  0xf9   :  { %v1149_v57 = vpop.permute.xlu2 %789 }
  0xfa   :  { %v792_v26 = vunpack.i.h.bf16 %v1149_v57  ;;  %v791_v37 = vunpack.i.l.bf16 %v1149_v57 }
 0x101   :  { %v1151_v58 = vpop.permute.xlu2 %809 }
 0x109   :  { %v1153_v60 = vpop.permute.xlu2 %829 }
 0x10a   :  { %v1155_v61 = vpop.permute.xlu0 %779 }
 0x10b   :  { %v782_v9 = vunpack.i.h.bf16 %v1155_v61  ;;  %v781_v10 = vunpack.i.l.bf16 %v1155_v61 }
 0x10d   :  { %v501_v16 = vsel %vm500_vm15, %v781_v10, %v782_v9  ;;  %v831_v10 = vunpack.i.l.bf16 %v1153_v60 }
 0x111   :  { %v1157_v63 = vpop.permute.xlu2 %839  ;;  %v785_v1 = vpop.permute.xlu1 %784 }
 0x112   :  { %v1159_v2 = vpop.permute.xlu0 %794  ;;  %v787_v27 = vunpack.i.h.bf16 %v785_v1  ;;  %v786_v29 = vunpack.i.l.bf16 %v785_v1 }
 0x114   :  { %v473_v53 = vsel %vm471_vm2, %v786_v29, %v787_v27 }
 0x119   :  { %v1161_v3 = vpop.permute.xlu2 %849  ;;  %v1163_v4 = vpop.permute.xlu1 %799 }
 0x11a   :  { %v820_v5 = vpop.permute.xlu0 %819 }
 0x11b   :  { %v822_v30 = vunpack.i.h.bf16 %v820_v5  ;;  %v821_v32 = vunpack.i.l.bf16 %v820_v5 }
 0x11d   :  { %v472_v52 = vsel %vm471_vm2, %v822_v30, %v786_v29  ;;  %v832_v30 = vunpack.i.h.bf16 %v1153_v60  ;;  %v801_v60 = vunpack.i.l.bf16 %v1163_v4 }
 0x121   :  { %v1165_v6 = vpop.permute.xlu2 %859  ;;  %v1167_v7 = vpop.permute.xlu1 %804 }
 0x122   :  { %v1169_v8 = vpop.permute.xlu0 %834  ;;  %v862_v38 = vunpack.i.h.bf16 %v1165_v6  ;;  %v861_v39 = vunpack.i.l.bf16 %v1165_v6  ;;  %v444_v6 = vsel %vm442_vm3, %v791_v37, %v792_v26 }
 0x123   :  { %v837_v13 = vunpack.i.h.bf16 %v1169_v8  ;;  %v836_v14 = vunpack.i.l.bf16 %v1169_v8 }
 0x124   :  { %v447_v5 = vsel %vm442_vm3, %v861_v39, %v862_v38 }
 0x125   :  { %v504_v15 = vsel %vm500_vm15, %v836_v14, %v837_v13  ;;  %v797_v14 = vunpack.i.h.bf16 %v1159_v2 }
 0x126   :  { %555 = vmatpush.msrb.mxu3 %v504_v15  ;;  %v796_v15 = vunpack.i.l.bf16 %v1159_v2 }
 0x128   :  { %556 = vmatpush.msrb.mxu3 %v501_v16 }
 0x129   :  { %v1181_v17 = vpop.permute.xlu1 %814  ;;  %v870_v19 = vpop.permute.xlu2 %869  ;;  %755 = vmatmul.msk.f32.vlgmr.msrb.gmra.mxu3 %vm518_vm1, %v1195_v25 }
 0x12a   :  { %v1183_v18 = vpop.permute.xlu0 %844  ;;  %v871_v33 = vunpack.i.l.bf16 %v870_v19  ;;  %v872_v40 = vunpack.i.h.bf16 %v870_v19 }
 0x12c   :  { %v474_v57 = vsel %vm471_vm2, %v787_v27, %v872_v40  ;;  %v841_v40 = vunpack.i.l.bf16 %v1157_v63 }
 0x131   :  { %v825_v20 = vpop.permute.xlu1 %824  ;;  %v1187_v23 = vpop.permute.xlu2 %874 }
 0x132   :  { %v1185_v21 = vpop.permute.xlu0 %879  ;;  %v826_v43 = vunpack.i.l.bf16 %v825_v20  ;;  %v827_v50 = vunpack.i.h.bf16 %v825_v20 }
 0x133   :  { %v881_v49 = vunpack.i.l.bf16 %v1185_v21  ;;  %v882_v55 = vunpack.i.h.bf16 %v1185_v21 }
 0x134   :  { %v446_v1 = vsel %vm442_vm3, %v826_v43, %v861_v39  ;;  %v443_v29 = vsel %vm442_vm3, %v827_v50, %v791_v37  ;;  %v802_v37 = vunpack.i.h.bf16 %v1163_v4  ;;  %v415_v43 = vsel %vm413_vm4, %v796_v15, %v797_v14 }
 0x135   :  { %v448_v19 = vsel %vm442_vm3, %v862_v38, %v881_v49  ;;  %v445_v2 = vsel %vm442_vm3, %v792_v26, %v882_v55  ;;  %v414_v26 = vsel %vm413_vm4, %v832_v30, %v796_v15  ;;  %v807_v50 = vunpack.i.h.bf16 %v1167_v7 }
 0x136   :  { %v386_v55 = vsel %vm384_vm5, %v801_v60, %v802_v37 }
 0x139   :  { %v855_v31 = vpop.permute.xlu1 %854  ;;  %v890_v56 = vpop.permute.xlu2 %889 }
 0x13a   :  { %v857_v34 = vunpack.i.h.bf16 %v855_v31  ;;  %v856_v36 = vunpack.i.l.bf16 %v855_v31  ;;  %v1203_v41 = vpop.permute.xlu0 %894  ;;  %v891_v20 = vunpack.i.l.bf16 %v890_v56  ;;  %v877_v31 = vunpack.i.h.bf16 %v1187_v23 }
 0x13c   :  { %v475_v44 = vsel %vm471_vm2, %v821_v32, %v856_v36  ;;  %v476_v47 = vsel %vm471_vm2, %v856_v36, %v857_v34  ;;  %v477_v48 = vsel %vm471_vm2, %v857_v34, %v871_v33  ;;  %v892_v32 = vunpack.i.h.bf16 %v890_v56 }
 0x13d   :  { %521 = vmatpush.msrb.mxu0 %v475_v44  ;;  %561 = vmatpush.msrb.mxu2 %v476_v47  ;;  %v876_v33 = vunpack.i.l.bf16 %v1187_v23  ;;  %v842_v44 = vunpack.i.h.bf16 %v1157_v63  ;;  %v847_v56 = vunpack.i.h.bf16 %v1183_v18  ;;  %v515_v23 = vperm.slane %v1192_v24, 0 }
 0x13e   :  { %601 = vmatpush.msrb.mxu1 %v477_v48  ;;  %v416_v47 = vsel %vm413_vm4, %v797_v14, %v892_v32  ;;  %vm653_vm2 = vcmask 1040384  }
 0x13f   :  { %522 = vmatpush.msrb.mxu0 %v472_v52  ;;  %562 = vmatpush.msrb.mxu2 %v473_v53  ;;  %v388_v48 = vsel %vm384_vm5, %v841_v40, %v876_v33  ;;  %v389_v49 = vsel %vm384_vm5, %v876_v33, %v877_v31  ;;  %v806_v52 = vunpack.i.l.bf16 %v1167_v7  ;;  %v385_v63 = vsel %vm384_vm5, %v842_v44, %v801_v60 }
 0x140   :  { %602 = vmatpush.msrb.mxu1 %v474_v57  ;;  %v846_v57 = vunpack.i.l.bf16 %v1183_v18  ;;  %v816_v60 = vunpack.i.l.bf16 %v1181_v17 }
 0x141   :  { %v865_v16 = vpop.permute.xlu1 %864  ;;  %523 = vmatpush.msrb.mxu0 %v446_v1  ;;  %563 = vmatpush.msrb.mxu2 %v447_v5  ;;  %v1256_v18 = vpop.permute.xlu2 %914 }
 0x142   :  { %v867_v21 = vunpack.i.h.bf16 %v865_v16  ;;  %v866_v27 = vunpack.i.l.bf16 %v865_v16  ;;  %603 = vmatpush.msrb.mxu1 %v448_v19  ;;  %v1230_v39 = vpop.permute.xlu0 %919  ;;  %v812_v16 = vunpack.i.h.bf16 %v1151_v58  ;;  %v811_v19 = vunpack.i.l.bf16 %v1151_v58 }
 0x143   :  { %564 = vmatpush.msrb.mxu2 %v444_v6  ;;  %524 = vmatpush.msrb.mxu0 %v443_v29  ;;  %v897_v6 = vunpack.i.h.bf16 %v1203_v41  ;;  %v917_v30 = vunpack.i.h.bf16 %v1256_v18  ;;  %v916_v32 = vunpack.i.l.bf16 %v1256_v18 }
 0x144   :  { %604 = vmatpush.msrb.mxu1 %v445_v2  ;;  %v417_v34 = vsel %vm413_vm4, %v831_v10, %v866_v27  ;;  %v418_v36 = vsel %vm413_vm4, %v866_v27, %v867_v21  ;;  %v419_v38 = vsel %vm413_vm4, %v867_v21, %v891_v20  ;;  %v896_v10 = vunpack.i.l.bf16 %v1203_v41 }
 0x145   :  { %525 = vmatpush.msrb.mxu0 %v417_v34  ;;  %565 = vmatpush.msrb.mxu2 %v418_v36  ;;  %v852_v20 = vunpack.i.h.bf16 %v1161_v3  ;;  %v851_v21 = vunpack.i.l.bf16 %v1161_v3  ;;  %v356_v27 = vsel %vm355_vm6, %v847_v56, %v806_v52  ;;  %v357_v41 = vsel %vm355_vm6, %v806_v52, %v807_v50 }
 0x146   :  { %605 = vmatpush.msrb.mxu1 %v419_v38  ;;  %v331_v33 = vsel %vm326_vm7, %v896_v10, %v897_v6  ;;  %v328_v36 = vsel %vm326_vm7, %v811_v19, %v812_v16  ;;  %v817_v38 = vunpack.i.h.bf16 %v1181_v17 }
 0x147   :  { %526 = vmatpush.msrb.mxu0 %v414_v26  ;;  %566 = vmatpush.msrb.mxu2 %v415_v43  ;;  %v330_v2 = vsel %vm326_vm7, %v851_v21, %v896_v10  ;;  %v327_v3 = vsel %vm326_vm7, %v852_v20, %v811_v19  ;;  %v302_v43 = vsel %vm297_vm8, %v916_v32, %v917_v30 }
 0x148   :  { %606 = vmatpush.msrb.mxu1 %v416_v47  ;;  %v922_v47 = vunpack.i.h.bf16 %v1230_v39  ;;  %v299_v17 = vsel %vm297_vm8, %v816_v60, %v817_v38 }
 0x149   :  { %v885_v53 = vpop.permute.xlu1 %884  ;;  %527 = vmatpush.msrb.mxu0 %v388_v48  ;;  %567 = vmatpush.msrb.mxu2 %v389_v49  ;;  %v921_v48 = vunpack.i.l.bf16 %v1230_v39 }
 0x14a   :  { %v887_v1 = vunpack.i.h.bf16 %v885_v53  ;;  %v886_v5 = vunpack.i.l.bf16 %v885_v53  ;;  %v925_v29 = vpop.permute.xlu0 %924  ;;  %v358_v4 = vsel %vm355_vm6, %v807_v50, %v922_v47 }
 0x14b   :  { %528 = vmatpush.msrb.mxu0 %v385_v63  ;;  %568 = vmatpush.msrb.mxu2 %v386_v55  ;;  %v926_v52 = vunpack.i.l.bf16 %v925_v29  ;;  %v927_v55 = vunpack.i.h.bf16 %v925_v29 }
 0x14c   :  { %v359_v14 = vsel %vm355_vm6, %v846_v57, %v886_v5  ;;  %v360_v15 = vsel %vm355_vm6, %v886_v5, %v887_v1  ;;  %v361_v53 = vsel %vm355_vm6, %v887_v1, %v921_v48 }
 0x14d   :  { %529 = vmatpush.msrb.mxu0 %v359_v14  ;;  %569 = vmatpush.msrb.mxu2 %v360_v15  ;;  %v332_v1 = vsel %vm326_vm7, %v897_v6, %v926_v52 }
 0x14f   :  { %530 = vmatpush.msrb.mxu0 %v356_v27  ;;  %570 = vmatpush.msrb.mxu2 %v357_v41 }
 0x151   :  { %v900_v34 = vpop.permute.xlu1 %899  ;;  %531 = vmatpush.msrb.mxu0 %v330_v2  ;;  %571 = vmatpush.msrb.mxu2 %v331_v33 }
 0x152   :  { %v902_v40 = vunpack.i.h.bf16 %v900_v34  ;;  %v901_v26 = vunpack.i.l.bf16 %v900_v34 }
 0x153   :  { %532 = vmatpush.msrb.mxu0 %v327_v3  ;;  %572 = vmatpush.msrb.mxu2 %v328_v36 }
 0x154   :  { %v390_v44 = vsel %vm384_vm5, %v877_v31, %v901_v26  ;;  %v387_v49 = vsel %vm384_vm5, %v802_v37, %v902_v40  ;;  %v935_v31 = vpop.permute.xlu0 %934  ;;  %v930_v37 = vpop.permute.xlu2 %929 }
 0x155   :  { %573 = vmatpush.msrb.mxu2 %v302_v43  ;;  %607 = vmatpush.msrb.mxu1 %v390_v44  ;;  %v936_v57 = vunpack.i.l.bf16 %v935_v31  ;;  %v937_v5 = vunpack.i.h.bf16 %v935_v31  ;;  %v932_v8 = vunpack.i.h.bf16 %v930_v37 }
 0x157   :  { %574 = vmatpush.msrb.mxu2 %v299_v17  ;;  %608 = vmatpush.msrb.mxu1 %v387_v49  ;;  %v303_v50 = vsel %vm297_vm8, %v917_v30, %v936_v57  ;;  %v300_v58 = vsel %vm297_vm8, %v817_v38, %v937_v5 }
 0x159   :  { %v905_v63 = vpop.permute.xlu1 %904  ;;  %575 = vmatpush.msrb.mxu2 %v1109_v35  ;;  %609 = vmatpush.msrb.mxu1 %v361_v53  ;;  %v931_v35 = vunpack.i.l.bf16 %v930_v37 }
 0x15a   :  { %v907_v39 = vunpack.i.h.bf16 %v905_v63  ;;  %v906_v56 = vunpack.i.l.bf16 %v905_v63 }
 0x15b   :  { %576 = vmatpush.msrb.mxu2 %v1083_v12  ;;  %610 = vmatpush.msrb.mxu1 %v358_v4  ;;  %v329_v12 = vsel %vm326_vm7, %v812_v16, %v927_v55 }
 0x15c   :  { %v505_v24 = vsel %vm500_vm15, %v837_v13, %v906_v56  ;;  %577 = vmatmul.f32.vlgmr.msrb.gmra.mxu2 %v515_v23  ;;  %v502_v7 = vsel %vm500_vm15, %v782_v9, %v907_v39  ;;  %v506_v13 = vsel %vm500_vm15, %v906_v56, %v931_v35  ;;  %v503_v9 = vsel %vm500_vm15, %v907_v39, %v932_v8 }
 0x15d   :  { %595 = vmatpush.msra.mxu3 %v505_v24  ;;  %611 = vmatpush.msrb.mxu1 %v332_v1  ;;  %vm646_vm15 = vcmp.lt.f32.partialorder %v1071_v0, 16.0 }
 0x15e   :  { %vm649_vm3 = vmand %vm643_vm14, %vm646_vm15 }
 0x15f   :  { %596 = vmatpush.msra.mxu3 %v502_v7  ;;  %612 = vmatpush.msrb.mxu1 %v329_v12 }
 0x160   :  { %756 = vmatmul.msk.f32.vlgmr.msra.gmra.mxu3 %vm518_vm1, %v1195_v25 }
 0x161   :  { %635 = vmatpush.msrb.mxu3 %v506_v13  ;;  %v910_v6 = vpop.permute.xlu1 %909  ;;  %613 = vmatpush.msrb.mxu1 %v303_v50 }
 0x162   :  { %v912_v61 = vunpack.i.h.bf16 %v910_v6  ;;  %v911_v10 = vunpack.i.l.bf16 %v910_v6 }
 0x163   :  { %636 = vmatpush.msrb.mxu3 %v503_v9  ;;  %614 = vmatpush.msrb.mxu1 %v300_v58 }
 0x164   :  { %v301_v14 = vsel %vm297_vm8, %v911_v10, %v916_v32  ;;  %v298_v15 = vsel %vm297_vm8, %v912_v61, %v816_v60  ;;  %vm704_vm8 = vcmp.lt.s32.totalorder %v30_v42, 384 }
 0x165   :  { %533 = vmatpush.msrb.mxu0 %v301_v14  ;;  %615 = vmatpush.msrb.mxu1 %v1127_v54 }
 0x167   :  { %534 = vmatpush.msrb.mxu0 %v298_v15  ;;  %616 = vmatpush.msrb.mxu1 %v1094_v22 }
 0x168   :  { %757 = vmatmul.msk.f32.vlgmr.msrb.gmra.mxu3 %vm518_vm1, %v1195_v25  ;;  %617 = vmatmul.f32.vlgmr.msrb.gmra.mxu1 %v515_v23  ;;  %vm647_vm1 = vmand %vm641_vm11, %vm644_vm12 }
 0x169   :  { %535 = vmatpush.msrb.mxu0 %v1101_v28 }
 0x16b   :  { %536 = vmatpush.msrb.mxu0 %v1081_v11 }
 0x16c   :  { %537 = vmatmul.f32.vlgmr.msrb.gmra.mxu0 %v515_v23 }
 0x1ac   :  { %v558_v16 = vpop.f32.mrf.mxu3 }
 0x1df   :  { %v578_v20 = vpop.f32.mrf.mxu2 }
 0x1e3   :  { %v598_v19 = vpop.f32.mrf.mxu3 }
 0x1e4   :  { %v599_v54 = vadd.f32 %v598_v19, %v578_v20 }
 0x1e5   :  { %v618_v11 = vpop.f32.mrf.mxu1 }
 0x1e6   :  { %v651_v28 = vsel %vm648_vm13, %v599_v54, -1e+30 }
 0x1e7   :  { %v655_v21 = vsel %vm653_vm2, %v651_v28, -inf }
 0x1e9   :  { %v538_v22 = vpop.f32.mrf.mxu0 }
 0x1ea   :  { %v559_v25 = vadd.f32 %v558_v16, %v538_v22 }
 0x1eb   :  { %v638_v18 = vpop.f32.mrf.mxu3 }
 0x1ec   :  { %v650_v46 = vsel %vm647_vm1, %v559_v25, -1e+30  ;;  %v639_v62 = vadd.f32 %v638_v18, %v618_v11 }
 0x1ed   :  { %v654_v45 = vsel %vm653_vm2, %v650_v46, -inf }
 0x1ee   :  { %v652_v59 = vsel %vm649_vm3, %v639_v62, -1e+30  ;;  %v657_v27 = vmax.f32 %v654_v45, %v655_v21 }
 0x1ef   :  { %v656_v51 = vsel %vm653_vm2, %v652_v59, -inf }
 0x1f0   :  { %v658_v41 = vmax.f32 %v657_v27, %v656_v51 }
 0x1f2   :  { %659 = vmax.xlane.f32.xlu1 %v658_v41 }
 0x265   :  { %v660_v0 = vpop.xlane.xlu1 %659 }
 0x266   :  { %v661_v29 = vsub.f32 %v650_v46, %v660_v0  ;;  %v662_v30 = vsub.f32 %v651_v28, %v660_v0  ;;  %v663_v32 = vsub.f32 %v652_v59, %v660_v0 }
 0x268   :  { %v664_v2 = vmul.f32 1.442695, %v661_v29  ;;  %v666_v33 = vmul.f32 1.442695, %v662_v30  ;;  %v668_v34 = vmul.f32 1.442695, %v663_v32 }
 0x26a   :  { %938 = vpow2.f32 %v664_v2 }
 0x26b   :  { %940 = vpow2.f32 %v666_v33 }
 0x26c   :  { %942 = vpow2.f32 %v668_v34 }
 0x270   :  { %v939_v3 = vpop.eup %938 }
 0x271   :  { %v941_v36 = vpop.eup %940  ;;  %v670_v38 = vsel %vm653_vm2, %v939_v3, 0.0 }
 0x272   :  { %v943_v60 = vpop.eup %942  ;;  %v671_v40 = vsel %vm653_vm2, %v941_v36, 0.0 }
 0x273   :  { %v672_v26 = vadd.f32 %v671_v40, %v670_v38  ;;  %v673_v43 = vsel %vm653_vm2, %v943_v60, 0.0 }
 0x275   :  { %v674_v44 = vadd.f32 %v673_v43, %v672_v26 }
 0x277   :  { %675 = vadd.xlane.f32.xlu2 %v674_v44 }
 0x2ea   :  { %v676_v47 = vpop.xlane.xlu2 %675 }
 0x2eb   :  { %944 = vrcp.f32 %v676_v47  ;;  %v688_v52 = vand.u32 2147483648, %v676_v47  ;;  %v686_v23 = vand.u32 2147483647, %v676_v47  ;;  %vm682_vm5 = vweird.f32 %v676_v47 }
 0x2ed   :  { %v689_v63 = vor.u32 1.1754944e-38, %v688_v52  ;;  %vm687_vm7 = vcmp.eq.f32.partialorder %v686_v23, 8.507059e+37 }
 0x2f1   :  { %v945_v48 = vpop.eup %944 }
 0x2f2   :  { %v678_v17 = vmul.f32 %v945_v48, %v676_v47  ;;  %vm683_vm4 = vweird.f32 %v945_v48 }
 0x2f3   :  { %vm684_vm6 = vmor %vm682_vm5, %vm683_vm4 }
 0x2f4   :  { %v679_v49 = vsub.f32 1.0, %v678_v17 }
 0x2f6   :  { %v680_v53 = vmul.f32 %v945_v48, %v679_v49 }
 0x2f8   :  { %v681_v31 = vadd.f32 %v945_v48, %v680_v53 }
 0x2fa   :  { %v685_v55 = vsel %vm684_vm6, %v945_v48, %v681_v31 }
 0x2fb   :  { %v690_v39 = vsel %vm687_vm7, %v689_v63, %v685_v55 }
 0x2fc   :  { %v692_v56 = vmul.f32 %v941_v36, %v690_v39  ;;  %v693_v4 = vmul.f32 %v943_v60, %v690_v39  ;;  %v691_v37 = vmul.f32 %v939_v3, %v690_v39 }
 0x2fe   :  { %v697_v57 = vrot.slane %v692_v56, 7  ;;  %v698_v24 = vrot.slane %v693_v4, 6 }
 0x300   :  { %v699_v1 = vsel %vm653_vm2, %v691_v37, %v697_v57 }
 0x301   :  { %v700_v35 = vsel %vm166_vm0, %v699_v1, %v698_v24 }
 0x302   :  { %706 = vst.msk [vmem:[%s1340_s4] sm:$0x7] %vm704_vm8, %v700_v35 }

</bundles_post_ra>
